<compile_context>
chip_gen: v5e
topology: v5e:2x2
jax: 0.10.0
libtpu: 0.0.40
codegen_flags: <defaults>
</compile_context>

<pallas_src>
import math

import jax
import jax.numpy as jnp
from jax.experimental import pallas as pl
from jax.experimental.pallas import tpu as pltpu

_VMEM_BUDGET = 12 * 1024 * 1024   # conservative double-buffered working-set budget
_VMEM_LIMIT = 32 * 1024 * 1024    # scoped VMEM limit (safe on v5e/v6e/v7x)


# ----------------------------------------------------------------------------
# Kernels
# ----------------------------------------------------------------------------
def _linear_bias_kernel(x_ref, w_ref, b_ref, o_ref):
    """One (tm, tn) output tile, full K in a single MXU pass, fused bias."""
    acc = jnp.dot(x_ref[...], w_ref[...], preferred_element_type=jnp.float32)
    o_ref[...] = (acc + b_ref[...].astype(jnp.float32)).astype(o_ref.dtype)


def _linear_bias_acc_kernel(x_ref, w_ref, b_ref, o_ref, acc_ref):
    """Fallback: K-tiled accumulation (only used when latent_dim is huge)."""
    k = pl.program_id(2)

    @pl.when(k == 0)
    def _():
        acc_ref[...] = jnp.zeros_like(acc_ref)

    acc_ref[...] += jnp.dot(
        x_ref[...], w_ref[...], preferred_element_type=jnp.float32
    )

    @pl.when(k == pl.num_programs(2) - 1)
    def _():
        o_ref[...] = (
            acc_ref[...] + b_ref[...].astype(jnp.float32)
        ).astype(o_ref.dtype)


# ----------------------------------------------------------------------------
# Tile selection
# ----------------------------------------------------------------------------
def _pick_tn(N, K, itemsize):
    """Output-class tile.  Full-N block if modest, else lane-aligned tile.

    Returns None if even the smallest tile blows the weight VMEM budget
    (-> use the K-tiled fallback)."""
    budget = _VMEM_BUDGET // 2
    cands = ([N] if N <= 512 else []) + [512, 256, 128]
    for tn in cands:
        if 2 * K * tn * itemsize <= budget:   # double-buffered weight block
            return tn
    return None


def _pick_tm(M, K, tn, itemsize):
    """Row tile for x / output, from a descending candidate list under budget."""
    if M <= 8:
        return M                               # full-dim block (always legal)
    budget = _VMEM_BUDGET - 2 * K * tn * itemsize
    for tm in (1024, 512, 256, 128, 64, 32, 16, 8):
        if tm > M:
            continue
        need = 2 * tm * K * itemsize + 2 * tm * tn * itemsize
        if need <= budget:
            return tm
    return 8


# ----------------------------------------------------------------------------
# Wrapper
# ----------------------------------------------------------------------------
def _ktiled_linear(x2, wt, b2, M, K, N, itemsize, cost):
    """Fallback path for very large latent_dim: K-tiled accumulator matmul."""
    tk = 512
    tn = N if N <= 256 else 256
    tm = M if M <= 8 else min(256, (M // 8) * 8)

    Kp = pl.cdiv(K, tk) * tk
    if Kp != K:
        # Zero-pad K only (required: a garbage K tail would corrupt valid rows).
        x2 = jnp.pad(x2, ((0, 0), (0, Kp - K)))
        wt = jnp.pad(wt, ((0, Kp - K), (0, 0)))

    grid = (pl.cdiv(M, tm), pl.cdiv(N, tn), Kp // tk)
    return pl.pallas_call(
        _linear_bias_acc_kernel,
        out_shape=jax.ShapeDtypeStruct((M, N), x2.dtype),
        grid=grid,
        in_specs=[
            pl.BlockSpec((tm, tk), lambda i, j, k: (i, k)),
            pl.BlockSpec((tk, tn), lambda i, j, k: (k, j)),
            pl.BlockSpec((1, tn), lambda i, j, k: (0, j)),
        ],
        out_specs=pl.BlockSpec((tm, tn), lambda i, j, k: (i, j)),
        scratch_shapes=[pltpu.VMEM((tm, tn), jnp.float32)],
        compiler_params=pltpu.CompilerParams(
            dimension_semantics=("parallel", "parallel", "arbitrary"),
            vmem_limit_bytes=_VMEM_LIMIT,
        ),
        cost_estimate=cost,
    )(x2, wt, b2)


def single_layer_decoder(x, weight, bias):
    """Pallas forward of SingleLayerDecoder: x @ weight.T + bias.

    x:      (..., latent_dim)
    weight: (nr_classes, latent_dim)   -- PyTorch nn.Linear layout
    bias:   (nr_classes,)
    """
    *lead, K = x.shape
    M = math.prod(lead) if lead else 1
    N = weight.shape[0]

    x2 = x.reshape(M, K)
    wt = weight.T                      # (K, N): contraction on sublanes, classes on lanes
    b2 = bias.reshape(1, N)
    itemsize = x.dtype.itemsize

    cost = pl.CostEstimate(
        flops=2 * M * K * N,
        transcendentals=0,
        bytes_accessed=(M * K + K * N + N + M * N) * itemsize,
    )

    tn = _pick_tn(N, K, itemsize)
    if tn is None:
        out = _ktiled_linear(x2, wt, b2, M, K, N, itemsize, cost)
        return out.reshape(*lead, N)

    tm = _pick_tm(M, K, tn, itemsize)

    # v7x megacore: make sure at least two parallel blocks exist when possible.
    if pl.cdiv(M, tm) == 1 and pl.cdiv(N, tn) == 1 and M >= 16:
        tm = max(8, ((M // 2 + 7) // 8) * 8)

    grid = (pl.cdiv(M, tm), pl.cdiv(N, tn))
    out = pl.pallas_call(
        _linear_bias_kernel,
        out_shape=jax.ShapeDtypeStruct((M, N), x.dtype),
        grid=grid,
        in_specs=[
            pl.BlockSpec((tm, K), lambda i, j: (i, 0)),   # full-K block: no reduction axis
            pl.BlockSpec((K, tn), lambda i, j: (0, j)),
            pl.BlockSpec((1, tn), lambda i, j: (0, j)),
        ],
        out_specs=pl.BlockSpec((tm, tn), lambda i, j: (i, j)),
        compiler_params=pltpu.CompilerParams(
            dimension_semantics=("parallel", "parallel"),
            vmem_limit_bytes=_VMEM_LIMIT,
        ),
        cost_estimate=cost,
    )(x2, wt, b2)

    return out.reshape(*lead, N)


# ----------------------------------------------------------------------------
# Self-test
# ----------------------------------------------------------------------------
if __name__ == "__main__":
    keys = jax.random.split(jax.random.PRNGKey(0), 6)

    # Case 1: module-typical tiny shapes (batch=2, latent_dim=32, nr_classes=10)
    batch, latent_dim, nr_classes = 2, 32, 10
    x = jax.random.normal(keys[0], (batch, latent_dim), dtype=jnp.float32)
    weight = jax.random.normal(keys[1], (nr_classes, latent_dim), dtype=jnp.float32) * 0.1
    bias = jax.random.normal(keys[2], (nr_classes,), dtype=jnp.float32) * 0.1

    y = single_layer_decoder(x, weight, bias)
    jax.block_until_ready(y)
    y_ref = x @ weight.T + bias
    ok = (
        y.shape == (batch, nr_classes)
        and y.dtype == x.dtype
        and bool(jnp.allclose(y, y_ref, rtol=1e-5, atol=1e-3))
    )

    # Case 2: leading dims + partial (masked) last M block and unaligned N.
    B2, T2, K2, N2 = 4, 40, 192, 37
    x_b = jax.random.normal(keys[3], (B2, T2, K2), dtype=jnp.float32)
    w_b = jax.random.normal(keys[4], (N2, K2), dtype=jnp.float32) * 0.05
    b_b = jax.random.normal(keys[5], (N2,), dtype=jnp.float32) * 0.05

    y2 = single_layer_decoder(x_b, w_b, b_b)
    jax.block_until_ready(y2)
    y2_ref = x_b @ w_b.T + b_b
    ok = ok and y2.shape == (B2, T2, N2) and bool(
        jnp.allclose(y2, y2_ref, rtol=1e-5, atol=1e-3)
    )

    assert ok
    print("KERNEL_OK")
</pallas_src>

<mosaic_0001>
module attributes {stable_mosaic.version = 11 : i64} {
  func.func @_linear_bias_kernel(%arg0: i32, %arg1: i32, %arg2: memref<2x32xf32, #tpu.memory_space<vmem>>, %arg3: memref<32x10xf32, #tpu.memory_space<vmem>>, %arg4: memref<1x10xf32, #tpu.memory_space<vmem>>, %arg5: memref<2x10xf32, #tpu.memory_space<vmem>>) attributes {dimension_semantics = [#tpu.dimension_semantics<parallel>, #tpu.dimension_semantics<parallel>], iteration_bounds = array<i64: 1, 1>, scalar_prefetch = 0 : i64, scratch_operands = 0 : i64, tpu.core_type = #tpu.core_type<tc>, window_params = [{transform_indices = @transform_0, window_bounds = array<i64: 2, 32>}, {transform_indices = @transform_1, window_bounds = array<i64: 32, 10>}, {transform_indices = @transform_2, window_bounds = array<i64: 1, 10>}, {transform_indices = @transform_3, window_bounds = array<i64: 2, 10>}]} {
    %c0 = arith.constant 0 : index
    %c0_0 = arith.constant 0 : index
    %0 = vector.load %arg2[%c0, %c0_0] : memref<2x32xf32, #tpu.memory_space<vmem>>, vector<2x32xf32>
    %c0_1 = arith.constant 0 : index
    %c0_2 = arith.constant 0 : index
    %1 = vector.load %arg3[%c0_1, %c0_2] : memref<32x10xf32, #tpu.memory_space<vmem>>, vector<32x10xf32>
    %cst = arith.constant dense<0.000000e+00> : vector<2x10xf32>
    %2 = tpu.matmul %0, %1, %cst {dimension_numbers = #tpu.dot_dimension_numbers<[1], [0], [0], [1], [0, 0, 1, 1], [], []>} : vector<2x32xf32>, vector<32x10xf32>, vector<2x10xf32> -> vector<2x10xf32>
    %c0_3 = arith.constant 0 : index
    %c0_4 = arith.constant 0 : index
    %3 = vector.load %arg4[%c0_3, %c0_4] : memref<1x10xf32, #tpu.memory_space<vmem>>, vector<1x10xf32>
    %4 = vector.broadcast %3 : vector<1x10xf32> to vector<2x10xf32>
    %5 = arith.addf %2, %4 : vector<2x10xf32>
    %c0_5 = arith.constant 0 : index
    %c0_6 = arith.constant 0 : index
    %6 = vector.load %arg5[%c0_5, %c0_6] : memref<2x10xf32, #tpu.memory_space<vmem>>, vector<2x10xf32>
    tpu.vector_store %arg5[%c0_5, %c0_6], %5 {strides = array<i32>} : memref<2x10xf32, #tpu.memory_space<vmem>>, vector<2x10xf32>,
    return
  }
  func.func @transform_0(%arg0: i32, %arg1: i32) -> (i32, i32) {
    %c0_i32 = arith.constant 0 : i32
    %c0_i32_0 = arith.constant 0 : i32
    return %arg0, %c0_i32 : i32, i32
  }
  func.func @transform_1(%arg0: i32, %arg1: i32) -> (i32, i32) {
    %c0_i32 = arith.constant 0 : i32
    %c0_i32_0 = arith.constant 0 : i32
    return %c0_i32, %arg1 : i32, i32
  }
  func.func @transform_2(%arg0: i32, %arg1: i32) -> (i32, i32) {
    %c0_i32 = arith.constant 0 : i32
    %c0_i32_0 = arith.constant 0 : i32
    return %c0_i32, %arg1 : i32, i32
  }
  func.func @transform_3(%arg0: i32, %arg1: i32) -> (i32, i32) {
    %c0_i32 = arith.constant 0 : i32
    return %arg0, %arg1 : i32, i32
  }
}

</mosaic_0001>

<bundles_post_ra>
// kernel: tpu_custom_call.1
= control target key start
LH: loop header
LB: loop body
LE: loop exit
PB: predicated region body
PF: predicated region fallthrough
CT: control target
= control target key end

     0   :  { %s137_s0 = inlined_call_operand.vmem [shape: f32[2,32], index: 0, kind: input, shape index: {}]   ;;  %s138_s1 = inlined_call_operand.vmem [shape: f32[32,10], index: 1, kind: input, shape index: {}]   ;;  %s139_s2 = inlined_call_operand.vmem [shape: f32[1,10], index: 2, kind: input, shape index: {}]   ;;  %s140_s3 = inlined_call_operand.hbm [shape: f32[2,10], index: 3, kind: output, shape index: {}]  }
   0x1   :  { %v19_v0 = vld [vmem:[%s138_s1 + $0x18] sm:$0xff]  ;;  %v18_v1 = vld [vmem:[%s138_s1 + $0x10] sm:$0xff]  ;;  %v17_v2 = vld [vmem:[%s138_s1 + $0x8] sm:$0xff] }
   0x2   :  { %40 = vmatpush.msra.mxu0 %v19_v0 }
   0x3   :  { %8 = vsyncpa [#allocation3], 0  ;;  %v16_v3 = vld [vmem:[%s138_s1] sm:$0xff]  ;;  %vm24_vm0 = vcmask 261120   ;;  %s95_s24 = smov [#allocation2]   ;;  %s57_s28 = sshll.u32 %s140_s3, 4  ;;  %s58_s28 = int_to_ptr.hbm [resolvable:$true] %s57_s28 }
   0x4   :  { %41 = vmatpush.msra.mxu0 %v18_v1  ;;  %v15_v4 = vld [vmem:[%s137_s0] sm:$0x3]  ;;  %s55_s25 = sshll.u32 %s95_s24, 4  ;;  %vm48_vm1 = vcmask 74752   ;;  %s56_s25 = int_to_ptr.vmem [resolvable:$true] %s55_s25 }
   0x5   :  { %v68_v5 = vld [vmem:[%s139_s2] ss:$0 sm:$0xff] }
   0x6   :  { %42 = vmatpush.msra.mxu0 %v17_v2 }
   0x8   :  { %43 = vmatpush.msra.mxu0 %v16_v3 }
   0x9   :  { %66 = vmatmul.msk.f32.vlgmr.msra.gmra.mxu0 %vm24_vm0, %v15_v4 }
  0x86   :  { %v45_v6 = vpop.f32.mrf.mxu0 }
  0x87   :  { %v46_v7 = vadd.f32 %v68_v5, %v45_v6 }
  0x89   :  { %49 = vst.msk [vmem:[#allocation2] sm:$0x3] %vm48_vm1, %v46_v7 }
  0x8a   :  { %60 = dma.vmem_to_hbm [thread:$0]  %s56_s25, 32, %s58_s28, [#allocation3]  }
  0x8b   :  { %93 = dma.done.wait [#allocation3], 32  }
  0x8c   :  { %94 = vsyncadd [#allocation3], 4294967264 }
  0x8d   :  { %65 = vsyncpa [#allocation3], 1 }

</bundles_post_ra>
